<compile_context>
chip_gen: v7x
topology: tpu7x:2x2x1
jax: 0.10.0
libtpu: 0.0.40
codegen_flags: <defaults>
</compile_context>

<pallas_src>
import jax
import jax.numpy as jnp
from jax import lax
from jax.experimental import pallas as pl
from jax.experimental.pallas import tpu as pltpu


def actor_net_kernel(x_ref, w1_ref, b1_ref, w2_ref, b2_ref, out_ref):
    # fc1: x @ w1.T -> (tb, H).  Contraction over D_in on both operands
    # (A @ B.T form) — MXU consumes the transposed operand natively.
    x = x_ref[...]                                            # (tb, D_in)
    h = lax.dot_general(x, w1_ref[...], (((1,), (1,)), ((), ())),
                        preferred_element_type=jnp.float32)   # (tb, H)
    h = jnp.maximum(h + b1_ref[...], 0.0)                     # + bias (1, H), ReLU

    # action head: h @ w2.T + b2 -> (tb, D_out)
    logits = lax.dot_general(h, w2_ref[...], (((1,), (1,)), ((), ())),
                             preferred_element_type=jnp.float32) + b2_ref[...]

    # Numerically-stable softmax over the action axis with an EXACT divide
    # (denominator is only a (tb, 1) vector — cost is negligible).
    m = jnp.max(logits, axis=-1, keepdims=True)
    e = jnp.exp(logits - m)
    out_ref[...] = (e / jnp.sum(e, axis=-1, keepdims=True)).astype(out_ref.dtype)


def _round_up(n, m):
    return ((n + m - 1) // m) * m


def actor_net_forward(x, w1, b1, w2, b2, *, block_b=2048):
    """x: (B, D_in) f32.  Weights in PyTorch layout: w1 (H, D_in), w2 (D_out, H);
    biases as row vectors b1 (1, H), b2 (1, D_out).
    Returns softmax probabilities (B, D_out) f32."""
    B, D_in = x.shape
    H = w1.shape[0]
    D_out = w2.shape[0]

    # Batch tiling:
    #  * n_tiles >= 2 whenever the batch is big enough, so the "parallel" grid
    #    axis actually feeds both of v7x's TensorCores (harmless on v5e/v6e).
    #  * tb sized to B / n_tiles rounded to the 8-sublane granule, so phantom
    #    padding is at most n_tiles*8 - 1 rows (not up to a whole tile).
    #  * block_b is a cap on rows per step; sweep 1024..8192 if tuning.
    n_tiles = max(1, pl.cdiv(B, block_b))
    if n_tiles < 2 and B >= 256:
        n_tiles = 2
    tb = _round_up(pl.cdiv(B, n_tiles), 8)
    b_pad = n_tiles * tb

    x_in = x if b_pad == B else jnp.pad(x, ((0, b_pad - B), (0, 0)))

    bytes_accessed = 4 * (b_pad * (D_in + D_out) + H * D_in + H + D_out * H + D_out)
    out = pl.pallas_call(
        actor_net_kernel,
        out_shape=jax.ShapeDtypeStruct((b_pad, D_out), jnp.float32),
        grid_spec=pltpu.PrefetchScalarGridSpec(
            num_scalar_prefetch=0,
            grid=(n_tiles,),
            in_specs=[
                pl.BlockSpec((tb, D_in), lambda i: (i, 0)),   # x tile (batch rows)
                pl.BlockSpec((H, D_in), lambda i: (0, 0)),    # w1: VMEM-resident
                pl.BlockSpec((1, H), lambda i: (0, 0)),       # b1: VMEM-resident
                pl.BlockSpec((D_out, H), lambda i: (0, 0)),   # w2: VMEM-resident
                pl.BlockSpec((1, D_out), lambda i: (0, 0)),   # b2: VMEM-resident
            ],
            # (tb, 2) store is lane-masked, but the output is only 8 B/row —
            # accepted trade-off to keep the whole pipeline transpose-free.
            out_specs=pl.BlockSpec((tb, D_out), lambda i: (i, 0)),
        ),
        compiler_params=pltpu.CompilerParams(
            # independent batch tiles -> shard across v7x's two TensorCores
            dimension_semantics=("parallel",),
            # headroom for large batch tiles on every generation (v5e default is 16 MiB)
            vmem_limit_bytes=32 * 1024 * 1024,
        ),
        cost_estimate=pl.CostEstimate(
            flops=2 * b_pad * (D_in * H + H * D_out),
            transcendentals=b_pad * D_out,
            bytes_accessed=bytes_accessed,
        ),
    )(x_in, w1, b1, w2, b2)

    return out if b_pad == B else out[:B]


def init_actor_net_params(key, input_dim, hidden_dim, output_dim):
    """nn.Linear-style init U(-1/sqrt(fan_in), 1/sqrt(fan_in)); PyTorch weight layout,
    biases kept as row vectors for in-kernel broadcasting."""
    k1, k2, k3, k4 = jax.random.split(key, 4)
    bound1 = 1.0 / jnp.sqrt(float(input_dim))
    bound2 = 1.0 / jnp.sqrt(float(hidden_dim))
    w1 = jax.random.uniform(k1, (hidden_dim, input_dim), jnp.float32, -bound1, bound1)
    b1 = jax.random.uniform(k2, (1, hidden_dim), jnp.float32, -bound1, bound1)
    w2 = jax.random.uniform(k3, (output_dim, hidden_dim), jnp.float32, -bound2, bound2)
    b2 = jax.random.uniform(k4, (1, output_dim), jnp.float32, -bound2, bound2)
    return w1, b1, w2, b2


if __name__ == "__main__":
    # TODO(synk): ActorNet.action() (Categorical sampling / log_prob) is host-side
    # control logic, not part of forward(); only the forward pass is kernelized.
    input_dim, hidden, output_dim = 4, 32, 2   # CartPole-style A2C actor
    batch = 8

    key = jax.random.PRNGKey(0)
    kx, kp = jax.random.split(key)
    x = jax.random.normal(kx, (batch, input_dim), jnp.float32)
    w1, b1, w2, b2 = init_actor_net_params(kp, input_dim, hidden, output_dim)

    dist = actor_net_forward(x, w1, b1, w2, b2)
    jax.block_until_ready(dist)

    # reference check in plain JAX (PyTorch semantics: y = x @ W.T + b)
    h_ref = jnp.maximum(x @ w1.T + b1, 0.0)
    logits_ref = h_ref @ w2.T + b2
    dist_ref = jax.nn.softmax(logits_ref, axis=-1)

    assert dist.shape == (batch, output_dim)
    assert jnp.allclose(dist, dist_ref, atol=2e-3), "mismatch vs reference"
    # exact divide -> rows sum to 1 to f32 rounding
    assert jnp.allclose(jnp.sum(dist, axis=-1), 1.0, atol=1e-5)

    print("KERNEL_OK")
</pallas_src>

<mosaic_0001>
module attributes {stable_mosaic.version = 11 : i64} {
  func.func @actor_net_kernel(%arg0: i32, %arg1: memref<8x4xf32, #tpu.memory_space<vmem>>, %arg2: memref<32x4xf32, #tpu.memory_space<vmem>>, %arg3: memref<1x32xf32, #tpu.memory_space<vmem>>, %arg4: memref<2x32xf32, #tpu.memory_space<vmem>>, %arg5: memref<1x2xf32, #tpu.memory_space<vmem>>, %arg6: memref<8x2xf32, #tpu.memory_space<vmem>>) attributes {dimension_semantics = [#tpu.dimension_semantics<parallel>], iteration_bounds = array<i64: 1>, scalar_prefetch = 0 : i64, scratch_operands = 0 : i64, tpu.core_type = #tpu.core_type<tc>, window_params = [{transform_indices = @transform_0, window_bounds = array<i64: 8, 4>}, {pipeline_mode = #tpu.pipeline_mode<synchronous>, transform_indices = @transform_1, window_bounds = array<i64: 32, 4>}, {pipeline_mode = #tpu.pipeline_mode<synchronous>, transform_indices = @transform_2, window_bounds = array<i64: 1, 32>}, {pipeline_mode = #tpu.pipeline_mode<synchronous>, transform_indices = @transform_3, window_bounds = array<i64: 2, 32>}, {pipeline_mode = #tpu.pipeline_mode<synchronous>, transform_indices = @transform_4, window_bounds = array<i64: 1, 2>}, {transform_indices = @transform_5, window_bounds = array<i64: 8, 2>}]} {
    %c0 = arith.constant 0 : index
    %c0_0 = arith.constant 0 : index
    %0 = vector.load %arg1[%c0, %c0_0] : memref<8x4xf32, #tpu.memory_space<vmem>>, vector<8x4xf32>
    %c0_1 = arith.constant 0 : index
    %c0_2 = arith.constant 0 : index
    %1 = vector.load %arg2[%c0_1, %c0_2] : memref<32x4xf32, #tpu.memory_space<vmem>>, vector<32x4xf32>
    %cst = arith.constant dense<0.000000e+00> : vector<8x32xf32>
    %2 = tpu.matmul %0, %1, %cst {dimension_numbers = #tpu.dot_dimension_numbers<[1], [1], [0], [0], [0, 0, 1, 0], [], []>} : vector<8x4xf32>, vector<32x4xf32>, vector<8x32xf32> -> vector<8x32xf32>
    %c0_3 = arith.constant 0 : index
    %c0_4 = arith.constant 0 : index
    %3 = vector.load %arg3[%c0_3, %c0_4] : memref<1x32xf32, #tpu.memory_space<vmem>>, vector<1x32xf32>
    %4 = vector.broadcast %3 : vector<1x32xf32> to vector<8x32xf32>
    %5 = arith.addf %2, %4 : vector<8x32xf32>
    %cst_5 = arith.constant 0.000000e+00 : f32
    %6 = vector.broadcast %cst_5 : f32 to vector<8x32xf32>
    %7 = arith.maximumf %5, %6 : vector<8x32xf32>
    %c0_6 = arith.constant 0 : index
    %c0_7 = arith.constant 0 : index
    %8 = vector.load %arg4[%c0_6, %c0_7] : memref<2x32xf32, #tpu.memory_space<vmem>>, vector<2x32xf32>
    %cst_8 = arith.constant dense<0.000000e+00> : vector<8x2xf32>
    %9 = tpu.matmul %7, %8, %cst_8 {dimension_numbers = #tpu.dot_dimension_numbers<[1], [1], [0], [0], [0, 0, 1, 0], [], []>} : vector<8x32xf32>, vector<2x32xf32>, vector<8x2xf32> -> vector<8x2xf32>
    %c0_9 = arith.constant 0 : index
    %c0_10 = arith.constant 0 : index
    %10 = vector.load %arg5[%c0_9, %c0_10] : memref<1x2xf32, #tpu.memory_space<vmem>>, vector<1x2xf32>
    %11 = vector.broadcast %10 : vector<1x2xf32> to vector<8x2xf32>
    %12 = arith.addf %9, %11 : vector<8x2xf32>
    %cst_11 = arith.constant dense<0xFF800000> : vector<8xf32>
    %13 = vector.multi_reduction <maximumf>, %12, %cst_11 [1] : vector<8x2xf32> to vector<8xf32>
    %14 = vector.shape_cast %13 : vector<8xf32> to vector<8x1xf32>
    %15 = vector.broadcast %14 : vector<8x1xf32> to vector<8x2xf32>
    %16 = arith.subf %12, %15 : vector<8x2xf32>
    %17 = math.exp %16 : vector<8x2xf32>
    %cst_12 = arith.constant dense<0.000000e+00> : vector<8xf32>
    %18 = vector.multi_reduction <add>, %17, %cst_12 [1] : vector<8x2xf32> to vector<8xf32>
    %19 = vector.shape_cast %18 : vector<8xf32> to vector<8x1xf32>
    %20 = vector.broadcast %19 : vector<8x1xf32> to vector<8x2xf32>
    %21 = arith.divf %17, %20 : vector<8x2xf32>
    %c0_13 = arith.constant 0 : index
    %c0_14 = arith.constant 0 : index
    %22 = vector.load %arg6[%c0_13, %c0_14] : memref<8x2xf32, #tpu.memory_space<vmem>>, vector<8x2xf32>
    tpu.vector_store %arg6[%c0_13, %c0_14], %21 {strides = array<i32>} : memref<8x2xf32, #tpu.memory_space<vmem>>, vector<8x2xf32>,
    return
  }
  func.func @transform_0(%arg0: i32) -> (i32, i32) {
    %c0_i32 = arith.constant 0 : i32
    %c0_i32_0 = arith.constant 0 : i32
    return %arg0, %c0_i32 : i32, i32
  }
  func.func @transform_1(%arg0: i32) -> (i32, i32) {
    %c0_i32 = arith.constant 0 : i32
    %c0_i32_0 = arith.constant 0 : i32
    %c0_i32_1 = arith.constant 0 : i32
    return %c0_i32, %c0_i32_0 : i32, i32
  }
  func.func @transform_2(%arg0: i32) -> (i32, i32) {
    %c0_i32 = arith.constant 0 : i32
    %c0_i32_0 = arith.constant 0 : i32
    %c0_i32_1 = arith.constant 0 : i32
    return %c0_i32, %c0_i32_0 : i32, i32
  }
  func.func @transform_3(%arg0: i32) -> (i32, i32) {
    %c0_i32 = arith.constant 0 : i32
    %c0_i32_0 = arith.constant 0 : i32
    %c0_i32_1 = arith.constant 0 : i32
    return %c0_i32, %c0_i32_0 : i32, i32
  }
  func.func @transform_4(%arg0: i32) -> (i32, i32) {
    %c0_i32 = arith.constant 0 : i32
    %c0_i32_0 = arith.constant 0 : i32
    %c0_i32_1 = arith.constant 0 : i32
    return %c0_i32, %c0_i32_0 : i32, i32
  }
  func.func @transform_5(%arg0: i32) -> (i32, i32) {
    %c0_i32 = arith.constant 0 : i32
    %c0_i32_0 = arith.constant 0 : i32
    return %arg0, %c0_i32 : i32, i32
  }
}

</mosaic_0001>

<bundles_post_ra>
// kernel: tpu_custom_call.1
= control target key start
LH: loop header
LB: loop body
LE: loop exit
PB: predicated region body
PF: predicated region fallthrough
CT: control target
= control target key end

     0   :  { %vm32_vm0 = vcmask 31744   ;;  %v268_v0 = vmov 0.0|0.0   ;;  %vm269_vm2 = vmmov 0   ;;  %v270_v3 = vmov 0.0   ;;  %s334_s1 = inlined_call_operand.vmem [shape: f32[32,4], index: 1, kind: input, shape index: {}]   ;;  %s335_s0 = inlined_call_operand.vmem [shape: f32[8,4], index: 0, kind: input, shape index: {}]   ;;  %s336_s3 = inlined_call_operand.vmem [shape: f32[2,32], index: 3, kind: input, shape index: {}]   ;;  %s337_s2 = inlined_call_operand.vmem [shape: f32[1,32], index: 2, kind: input, shape index: {}]   ;;  %s338_s4 = inlined_call_operand.vmem [shape: f32[1,2], index: 4, kind: input, shape index: {}]   ;;  %s339_s5 = inlined_call_operand.vmem [shape: f32[8,2], index: 5, kind: output, shape index: {}]  }
   0x1   :  { %253 = vmatprep.subr.bf16.mxu0 %v268_v0  ;;  %v21_v1 = vld [vmem:[%s334_s1] sm:$0xff]  ;;  %v22_v2 = vld [vmem:[%s334_s1 + $0x8] sm:$0xff]  ;;  %vm255_vm1 = vmpackc.low %vm32_vm0, %vm32_vm0  ;;  %245 = vmatprep.mubr.msk.f32.mxu0 %vm269_vm2, %v270_v3  ;;  %vm127_vm3 = vcmask 261120   ;;  %vm204_vm4 = vcmask 15360  }
   0x2   :  { %v254_v4 = vpack.c.bf16 %v22_v2, %v21_v1  ;;  %248 = vmatprep.subr.mxu1 %v270_v3  ;;  %250 = vmatprep.mubr.msk.f32.mxu1 %vm269_vm2, %v270_v3  ;;  %v23_v5 = vld [vmem:[%s334_s1 + $0x10] sm:$0xff]  ;;  %v24_v6 = vld [vmem:[%s334_s1 + $0x18] sm:$0xff]  ;;  %v20_v8 = vld [vmem:[%s335_s0] sm:$0xff] }
   0x3   :  { %v258_v7 = vpack.c.bf16 %v24_v6, %v23_v5  ;;  %v119_v9 = vld [vmem:[%s336_s3] sm:$0x3] }
   0x4   :  { %256 = vmatpush3.bf16.xpose.msk.msra.mxu0 %vm255_vm1, %v254_v4  ;;  %249 = vmatpush3.xpose.msk.msra.mxu1 %vm127_vm3, %v119_v9  ;;  %v221_v10 = vld [vmem:[%s337_s2] ss:$0 sm:$0xff] }
   0x5   :  { %257 = vmatprep.subr.bf16.mxu0 %v268_v0  ;;  %v227_v15 = vld [vmem:[%s338_s4] ss:$0 sm:$0xff] }
   0xc   :  { %260 = vmatpush3.bf16.xpose.msk.msra.mxu0 %vm255_vm1, %v258_v7 }
  0x13   :  { %246 = vmatmul.mubr.msk.f32.vlgmr.msra.gmra.mrb[0].mxu0 %vm32_vm0, %v20_v8 }
  0xe6   :  { %v114_v11 = vpop.f32.mrb[0].mxu0 }
  0xe7   :  { %v115_v12 = vadd.f32 %v221_v10, %v114_v11  ;;  %v247_v13 = vpop.f32.mrb[1].mxu0 }
  0xe9   :  { %v118_v14 = vmax.f32 %v115_v12, 0.0 }
  0xeb   :  { %251 = vmatmul.mubr.msk.f32.vlgmr.msra.gmra.mrb[0].mxu1 %vm127_vm3, %v118_v14 }
 0x1be   :  { %v200_v16 = vpop.f32.mrb[0].mxu1 }
 0x1bf   :  { %v201_v17 = vadd.f32 %v227_v15, %v200_v16  ;;  %v252_v18 = vpop.f32.mrb[1].mxu1 }
 0x1c1   :  { %v205_v19 = vsel %vm204_vm4, %v201_v17, -inf }
 0x1c2   :  { %206 = vmax.xlane.f32.xlu0 %v205_v19 }
 0x24f   :  { %v207_v20 = vpop.xlane.xlu0 %206 }
 0x250   :  { %v208_v21 = vsub.f32 %v201_v17, %v207_v20 }
 0x252   :  { %v209_v22 = vmul.f32 1.442695, %v208_v21 }
 0x254   :  { %264 = vpow2.f32 %v209_v22 }
 0x25e   :  { %v265_v23 = vpop.eup %264 }
 0x25f   :  { %v211_v24 = vsel %vm204_vm4, %v265_v23, 0.0 }
 0x260   :  { %212 = vadd.xlane.f32.xlu0 %v211_v24 }
 0x2ed   :  { %v213_v25 = vpop.xlane.xlu0 %212 }
 0x2ee   :  { %266 = vrcp.f32 %v213_v25 }
 0x2f8   :  { %v267_v26 = vpop.eup %266 }
 0x2f9   :  { %v215_v27 = vmul.f32 %v267_v26, %v265_v23 }
 0x2fb   :  { %216 = vst.msk [vmem:[%s339_s5] sm:$0xff] %vm204_vm4, %v215_v27 }

</bundles_post_ra>
